<compile_context>
chip_gen: v6e
topology: v6e:2x2x1
jax: 0.10.0
libtpu: 0.0.40
codegen_flags: <defaults>
</compile_context>

<pallas_src>
import functools

import jax
import jax.numpy as jnp
from jax import lax
from jax.experimental import pallas as pl
from jax.experimental.pallas import tpu as pltpu

LANE = 128                     # lane width: last dim of every block
CHUNK_ROWS = 256               # in-kernel sub-chunk (bounds temps / vreg live ranges)
ACC_ROWS = 64                  # 8 parallel (8,128) f32 accumulators
MAX_BLOCK_ROWS = 8192          # 4 MiB f32 per input per pipeline buffer
VMEM_LIMIT = 32 * 1024 * 1024  # 2 inputs x 2 bufs x 4 MiB + chunk temps, all gens


def _round_up(v, m):
    return ((v + m - 1) // m) * m


def _tree_sum(parts):
    """Balanced binary tree of vector adds (log depth, fills all VALU slots)."""
    while len(parts) > 1:
        nxt = [parts[i] + parts[i + 1] for i in range(0, len(parts) - 1, 2)]
        if len(parts) % 2:
            nxt.append(parts[-1])
        parts = nxt
    return parts[0]


def _focal_kernel(x_ref, t_ref, out_ref, *, alpha, gamma, block_rows,
                  chunk_rows, n_chunks, valid_rows, need_mask):
    """Per-grid-step partial sum of the focal loss as one (8,128) f32 tile."""
    alpha = jnp.float32(alpha)

    def chunk_partial(off):
        x = x_ref[pl.ds(off, chunk_rows), :].astype(jnp.float32)
        t = t_ref[pl.ds(off, chunk_rows), :].astype(jnp.float32)
        if need_mask:
            # Ragged last grid block: rows >= valid_rows hold undefined data.
            # Mask the *inputs* to a zero-loss point (x=-200, t=0) before any
            # exp/log so garbage can never turn into NaN.
            row0 = pl.program_id(0) * block_rows + off
            gid = row0 + lax.broadcasted_iota(jnp.int32, (chunk_rows, LANE), 0)
            ok = gid < valid_rows
            x = jnp.where(ok, x, -200.0)
            t = jnp.where(ok, t, 0.0)

        pos = x >= 0.0
        hit = (t > 0.5) == pos               # logit sign agrees with the label
        e = jnp.exp(-jnp.abs(x))             # EUP exp (shared by bce and pt)
        # Numerically-stable binary_cross_entropy_with_logits, reduction='none':
        bce = jnp.maximum(x, 0.0) - x * t + jnp.log1p(e)   # EUP log1p
        # pt = exp(-bce) computed algebraically (binary 0/1 targets, as the
        # alpha gather in the reference requires):
        #   exp(x*t - max(x,0)) = 1 if hit else e
        #   1 - pt = (e if hit else 1) / (1 + e)      -- no cancellation.
        one_m_pt = jnp.where(hit, e, 1.0) * pl.reciprocal(1.0 + e, approx=True)

        g = float(gamma)
        if g == int(g) and 0 <= int(g) <= 8:
            gi = int(g)
            if gi == 0:
                mod = jnp.ones_like(one_m_pt)
            else:
                mod = one_m_pt
                for _ in range(gi - 1):
                    mod = mod * one_m_pt
        else:
            mod = jnp.maximum(one_m_pt, 0.0) ** jnp.float32(g)

        at = jnp.where(t > 0.5, 1.0 - alpha, alpha)   # alpha_table.gather(targets)
        f = at * mod * bce                            # (chunk_rows, LANE) f32

        # Tree-reduce the chunk down to (ACC_ROWS, LANE): pure VPU adds.
        return _tree_sum([f[s * ACC_ROWS:(s + 1) * ACC_ROWS, :]
                          for s in range(chunk_rows // ACC_ROWS)])

    if n_chunks == 1:
        acc = chunk_partial(0)
    else:
        def body(c, acc):
            off = pl.multiple_of(c * chunk_rows, chunk_rows)
            return acc + chunk_partial(off)
        acc = lax.fori_loop(0, n_chunks, body,
                            jnp.zeros((ACC_ROWS, LANE), jnp.float32), unroll=2)

    # Fold the 8 parallel accumulators into one vreg-shaped (8,128) partial.
    out_ref[...] = _tree_sum([acc[s * 8:(s + 1) * 8, :]
                              for s in range(ACC_ROWS // 8)])


def weighted_focal_loss(inputs, targets, alpha=0.25, gamma=2):
    """Pallas TPU implementation of WeightedFocalLoss.forward (scalar f32)."""
    assert inputs.shape == targets.shape
    n_valid = int(inputs.size)
    assert n_valid > 0

    x = inputs.reshape(-1)
    t = targets.reshape(-1)
    # HBM traffic: keep logits in native dtype (bf16 halves bytes); ship
    # bool/int targets as int8 (1 B/elem).  The kernel does f32 math inside.
    if x.dtype == jnp.bool_:
        x = x.astype(jnp.float32)
    if t.dtype == jnp.bool_ or jnp.issubdtype(t.dtype, jnp.integer):
        t = t.astype(jnp.int8)

    rows = pl.cdiv(n_valid, LANE)

    if rows <= CHUNK_ROWS:
        # Tiny input: one block, one chunk.  Row-pad to the accumulator
        # granularity (the copy is negligible at this size).
        chunk_rows = block_rows = max(ACC_ROWS, _round_up(rows, ACC_ROWS))
        row_pad = block_rows - rows
    else:
        # Big input: no row padding (ragged last block is masked in-kernel).
        # >= 2 blocks so the "parallel" grid axis can use both v7x TCs.
        chunk_rows = CHUNK_ROWS
        block_rows = min(MAX_BLOCK_ROWS,
                         _round_up(pl.cdiv(rows, 2), CHUNK_ROWS))
        row_pad = 0

    total_rows = rows + row_pad
    pad = total_rows * LANE - n_valid
    if pad:
        # Pad value (x=-200, t=0) gives exactly zero focal loss (exp(-200)
        # underflows to 0 in f32, so bce == 0).  Only happens when
        # numel % 128 != 0 or for tiny inputs.
        x = jnp.pad(x, (0, pad), constant_values=-200.0)
        t = jnp.pad(t, (0, pad), constant_values=0)
    x2 = x.reshape(total_rows, LANE)
    t2 = t.reshape(total_rows, LANE)

    num_blocks = pl.cdiv(total_rows, block_rows)
    need_mask = (total_rows % block_rows) != 0   # ragged last grid block

    kernel = functools.partial(
        _focal_kernel, alpha=float(alpha), gamma=float(gamma),
        block_rows=block_rows, chunk_rows=chunk_rows,
        n_chunks=block_rows // chunk_rows, valid_rows=total_rows,
        need_mask=need_mask)

    partials = pl.pallas_call(
        kernel,
        out_shape=jax.ShapeDtypeStruct((num_blocks * 8, LANE), jnp.float32),
        grid_spec=pltpu.PrefetchScalarGridSpec(
            num_scalar_prefetch=0,
            grid=(num_blocks,),
            in_specs=[
                pl.BlockSpec((block_rows, LANE), lambda i: (i, 0)),
                pl.BlockSpec((block_rows, LANE), lambda i: (i, 0)),
            ],
            out_specs=pl.BlockSpec((8, LANE), lambda i: (i, 0)),
        ),
        compiler_params=pltpu.CompilerParams(
            dimension_semantics=("parallel",),
            vmem_limit_bytes=VMEM_LIMIT,
        ),
    )(x2, t2)

    # Tiny cross-lane reduction + mean stays in plain JAX.
    return jnp.sum(partials) / jnp.float32(n_valid)


def _reference(inputs, targets, alpha=0.25, gamma=2):
    """Pure-JAX reference mirroring the PyTorch forward."""
    x = inputs.astype(jnp.float32)
    t = targets.astype(jnp.float32)
    bce = jnp.maximum(x, 0.0) - x * t + jnp.log1p(jnp.exp(-jnp.abs(x)))
    pt = jnp.exp(-bce)
    at = jnp.where(t > 0.5, 1.0 - alpha, alpha)
    return jnp.mean(at * ((1.0 - pt) ** gamma) * bce)


if __name__ == "__main__":
    key = jax.random.PRNGKey(0)
    kx, kt = jax.random.split(key)

    # Small shape consistent with a dense per-pixel binary classification map.
    shape = (2, 4, 16, 16)  # NCHW logits
    inputs = jax.random.normal(kx, shape, dtype=jnp.float32)
    targets = jax.random.bernoulli(kt, p=0.3, shape=shape).astype(jnp.float32)

    loss = weighted_focal_loss(inputs, targets, alpha=0.25, gamma=2)
    loss = jax.block_until_ready(loss)

    ref = _reference(inputs, targets, alpha=0.25, gamma=2)
    # Tolerance accounts for the approximate EUP reciprocal (O(1e-4) relative).
    assert jnp.allclose(loss, ref, rtol=3e-3, atol=1e-6), (loss, ref)

    print("KERNEL_OK")
</pallas_src>

<mosaic_0001>
module attributes {stable_mosaic.version = 11 : i64} {
  func.func @_focal_kernel(%arg0: i32, %arg1: memref<64x128xf32, #tpu.memory_space<vmem>>, %arg2: memref<64x128xf32, #tpu.memory_space<vmem>>, %arg3: memref<8x128xf32, #tpu.memory_space<vmem>>) attributes {dimension_semantics = [#tpu.dimension_semantics<parallel>], iteration_bounds = array<i64: 1>, scalar_prefetch = 0 : i64, scratch_operands = 0 : i64, tpu.core_type = #tpu.core_type<tc>, window_params = [{transform_indices = @transform_0, window_bounds = array<i64: 64, 128>}, {transform_indices = @transform_1, window_bounds = array<i64: 64, 128>}, {transform_indices = @transform_2, window_bounds = array<i64: 8, 128>}]} {
    %c0 = arith.constant 0 : index
    %c0_0 = arith.constant 0 : index
    %0 = vector.load %arg1[%c0, %c0_0] : memref<64x128xf32, #tpu.memory_space<vmem>>, vector<64x128xf32>
    %c0_1 = arith.constant 0 : index
    %c0_2 = arith.constant 0 : index
    %1 = vector.load %arg2[%c0_1, %c0_2] : memref<64x128xf32, #tpu.memory_space<vmem>>, vector<64x128xf32>
    %cst = arith.constant 0.000000e+00 : f32
    %2 = vector.broadcast %cst : f32 to vector<64x128xf32>
    %3 = arith.cmpf oge, %0, %2 : vector<64x128xf32>
    %cst_3 = arith.constant 5.000000e-01 : f32
    %4 = vector.broadcast %cst_3 : f32 to vector<64x128xf32>
    %5 = arith.cmpf ogt, %1, %4 : vector<64x128xf32>
    %6 = arith.xori %5, %3 : vector<64x128xi1>
    %cst_4 = arith.constant dense<true> : vector<64x128xi1>
    %7 = arith.xori %6, %cst_4 : vector<64x128xi1>
    %8 = math.absf %0 : vector<64x128xf32>
    %cst_5 = arith.constant 0.000000e+00 : f32
    %9 = vector.broadcast %cst_5 : f32 to vector<64x128xf32>
    %10 = arith.subf %9, %8 : vector<64x128xf32>
    %11 = math.exp %10 : vector<64x128xf32>
    %cst_6 = arith.constant 0.000000e+00 : f32
    %12 = vector.broadcast %cst_6 : f32 to vector<64x128xf32>
    %13 = arith.maximumf %0, %12 : vector<64x128xf32>
    %14 = arith.mulf %0, %1 : vector<64x128xf32>
    %15 = arith.subf %13, %14 : vector<64x128xf32>
    %16 = math.log1p %11 : vector<64x128xf32>
    %17 = arith.addf %15, %16 : vector<64x128xf32>
    %cst_7 = arith.constant 1.000000e+00 : f32
    %18 = vector.broadcast %cst_7 : f32 to vector<64x128xf32>
    %19 = arith.select %7, %11, %18 : vector<64x128xi1>, vector<64x128xf32>
    %cst_8 = arith.constant 1.000000e+00 : f32
    %20 = vector.broadcast %cst_8 : f32 to vector<64x128xf32>
    %21 = arith.addf %20, %11 : vector<64x128xf32>
    %22 = tpu.reciprocal %21 {approx = true} : vector<64x128xf32> -> vector<64x128xf32>
    %23 = arith.mulf %19, %22 : vector<64x128xf32>
    %24 = arith.mulf %23, %23 : vector<64x128xf32>
    %cst_9 = arith.constant 5.000000e-01 : f32
    %25 = vector.broadcast %cst_9 : f32 to vector<64x128xf32>
    %26 = arith.cmpf ogt, %1, %25 : vector<64x128xf32>
    %cst_10 = arith.constant 1.000000e+00 : f32
    %cst_11 = arith.constant 2.500000e-01 : f32
    %27 = arith.subf %cst_10, %cst_11 : f32
    %cst_12 = arith.constant 2.500000e-01 : f32
    %28 = vector.broadcast %27 : f32 to vector<64x128xf32>
    %29 = vector.broadcast %cst_12 : f32 to vector<64x128xf32>
    %30 = arith.select %26, %28, %29 : vector<64x128xi1>, vector<64x128xf32>
    %31 = arith.mulf %30, %24 : vector<64x128xf32>
    %32 = arith.mulf %31, %17 : vector<64x128xf32>
    %33 = vector.extract_strided_slice %32 {offsets = [0, 0], sizes = [8, 128], strides = [1, 1]} : vector<64x128xf32> to vector<8x128xf32>
    %34 = vector.extract_strided_slice %32 {offsets = [8, 0], sizes = [8, 128], strides = [1, 1]} : vector<64x128xf32> to vector<8x128xf32>
    %35 = vector.extract_strided_slice %32 {offsets = [16, 0], sizes = [8, 128], strides = [1, 1]} : vector<64x128xf32> to vector<8x128xf32>
    %36 = vector.extract_strided_slice %32 {offsets = [24, 0], sizes = [8, 128], strides = [1, 1]} : vector<64x128xf32> to vector<8x128xf32>
    %37 = vector.extract_strided_slice %32 {offsets = [32, 0], sizes = [8, 128], strides = [1, 1]} : vector<64x128xf32> to vector<8x128xf32>
    %38 = vector.extract_strided_slice %32 {offsets = [40, 0], sizes = [8, 128], strides = [1, 1]} : vector<64x128xf32> to vector<8x128xf32>
    %39 = vector.extract_strided_slice %32 {offsets = [48, 0], sizes = [8, 128], strides = [1, 1]} : vector<64x128xf32> to vector<8x128xf32>
    %40 = vector.extract_strided_slice %32 {offsets = [56, 0], sizes = [8, 128], strides = [1, 1]} : vector<64x128xf32> to vector<8x128xf32>
    %41 = arith.addf %33, %34 : vector<8x128xf32>
    %42 = arith.addf %35, %36 : vector<8x128xf32>
    %43 = arith.addf %37, %38 : vector<8x128xf32>
    %44 = arith.addf %39, %40 : vector<8x128xf32>
    %45 = arith.addf %41, %42 : vector<8x128xf32>
    %46 = arith.addf %43, %44 : vector<8x128xf32>
    %47 = arith.addf %45, %46 : vector<8x128xf32>
    %c0_13 = arith.constant 0 : index
    %c0_14 = arith.constant 0 : index
    %48 = vector.load %arg3[%c0_13, %c0_14] : memref<8x128xf32, #tpu.memory_space<vmem>>, vector<8x128xf32>
    tpu.vector_store %arg3[%c0_13, %c0_14], %47 {strides = array<i32>} : memref<8x128xf32, #tpu.memory_space<vmem>>, vector<8x128xf32>,
    return
  }
  func.func @transform_0(%arg0: i32) -> (i32, i32) {
    %c0_i32 = arith.constant 0 : i32
    %c0_i32_0 = arith.constant 0 : i32
    return %arg0, %c0_i32 : i32, i32
  }
  func.func @transform_1(%arg0: i32) -> (i32, i32) {
    %c0_i32 = arith.constant 0 : i32
    %c0_i32_0 = arith.constant 0 : i32
    return %arg0, %c0_i32 : i32, i32
  }
  func.func @transform_2(%arg0: i32) -> (i32, i32) {
    %c0_i32 = arith.constant 0 : i32
    %c0_i32_0 = arith.constant 0 : i32
    return %arg0, %c0_i32 : i32, i32
  }
}

</mosaic_0001>

<bundles_post_ra>
// kernel: tpu_custom_call.1
= control target key start
LH: loop header
LB: loop body
LE: loop exit
PB: predicated region body
PF: predicated region fallthrough
CT: control target
= control target key end

     0   :  { %7 = vsyncpa [#allocation3], 0  ;;  %s886_s0 = inlined_call_operand.hbm [shape: f32[64,128], index: 0, kind: input, shape index: {}]   ;;  %s887_s1 = inlined_call_operand.hbm [shape: f32[64,128], index: 1, kind: input, shape index: {}]   ;;  %s888_s2 = inlined_call_operand.hbm [shape: f32[8,128], index: 2, kind: output, shape index: {}]  }
   0x1   :  { %8 = vsyncpa [#allocation6], 0 }
   0x2   :  { %9 = vsyncpa [#allocation4], 0  ;;  %s433_s9 = smov [#allocation2]  }
   0x3   :  { %s15_s10 = sshll.u32 %s433_s9, 4  ;;  %s16_s10 = int_to_ptr.vmem [resolvable:$true] %s15_s10 }
   0x4   :  { %s375_s11 = scalar_lea.vmem %s16_s10, 1024  ;;  %p380_p1 = scmp.lt.s32.totalorder %s16_s10, %s16_s10 }
   0x5   :  { %p376_p0 = scmp.ne.s32.totalorder %s16_s10, %s375_s11  ;;  %p381_p2 = scmp.lt.s32.totalorder %s375_s11, %s375_s11 }
   0x7   :  { %p382_p3 = por %p381_p2, %p380_p1 }
   0x9   :  { %p383_p4 = pnand %p382_p3, %p376_p0 }
   0xb   :  { %386 = shalt.err (!%p383_p4)
}
   0xc   :  { %s434_s12 = smov 128   ;;  %s435_s13 = smov 8  }
   0xd   :  { %21 = dma.hbm_to_vmem [thread:$0]  %s886_s0, 1024, %s16_s10, [#allocation3], %s434_s12, %s434_s12, %s435_s13  }
   0xe   :  { %s436_s16 = smov [#allocation5]  }
   0xf   :  { %s27_s17 = sshll.u32 %s436_s16, 4  ;;  %s28_s17 = int_to_ptr.vmem [resolvable:$true] %s27_s17 }
  0x10   :  { %s395_s18 = scalar_lea.vmem %s28_s17, 1024  ;;  %p400_p6 = scmp.lt.s32.totalorder %s28_s17, %s28_s17 }
  0x11   :  { %p396_p5 = scmp.ne.s32.totalorder %s28_s17, %s395_s18  ;;  %p401_p7 = scmp.lt.s32.totalorder %s395_s18, %s395_s18 }
  0x13   :  { %p402_p8 = por %p401_p7, %p400_p6 }
  0x15   :  { %p403_p9 = pnand %p402_p8, %p396_p5 }
  0x17   :  { %406 = shalt.err (!%p403_p9)
}
  0x18   :  { %33 = dma.hbm_to_vmem [thread:$0]  %s887_s1, 1024, %s28_s17, [#allocation6], %s434_s12, %s434_s12, %s435_s13  }
  0x19   :  { %427 = dma.done.wait [#allocation3], 1024  }
  0x1a   :  { %428 = vsyncadd [#allocation3], 4294966272 }
  0x1b   :  { %429 = dma.done.wait [#allocation6], 1024  }
  0x1c   :  { %430 = vsyncadd [#allocation6], 4294966272  ;;  %v461_v0 = vld [vmem:[#allocation2] sm:$0xff]  ;;  %v463_v1 = vld [vmem:[#allocation2 + $0x8] sm:$0xff]  ;;  %s439_s0 = smov [#allocation7]  }
  0x1d   :  { %v465_v2 = vld [vmem:[#allocation2 + $0x10] sm:$0xff]  ;;  %v467_v3 = vld [vmem:[#allocation2 + $0x18] sm:$0xff]  ;;  %v469_v4 = vld [vmem:[#allocation2 + $0x20] sm:$0xff]  ;;  %v88_v7 = vand.u32 2147483647, %v461_v0  ;;  %vm56_vm0 = vcmp.ge.f32.partialorder %v461_v0, 0.0 }
  0x1e   :  { %v471_v5 = vld [vmem:[#allocation2 + $0x28] sm:$0xff]  ;;  %v473_v6 = vld [vmem:[#allocation2 + $0x30] sm:$0xff]  ;;  %v476_v8 = vld [vmem:[#allocation2 + $0x38] sm:$0xff]  ;;  %v89_v9 = vand.u32 2147483647, %v463_v1  ;;  %vm57_vm1 = vcmp.ge.f32.partialorder %v463_v1, 0.0 }
  0x1f   :  { %v90_v10 = vand.u32 2147483647, %v465_v2  ;;  %v91_v11 = vand.u32 2147483647, %v467_v3  ;;  %v92_v12 = vand.u32 2147483647, %v469_v4 }
  0x20   :  { %v93_v13 = vand.u32 2147483647, %v471_v5  ;;  %v94_v14 = vand.u32 2147483647, %v473_v6  ;;  %v96_v15 = vsub.f32 0.0, %v88_v7  ;;  %v97_v16 = vsub.f32 0.0, %v89_v9 }
  0x21   :  { %v95_v17 = vand.u32 2147483647, %v476_v8  ;;  %v98_v18 = vsub.f32 0.0, %v90_v10  ;;  %v99_v19 = vsub.f32 0.0, %v91_v11  ;;  %v100_v20 = vsub.f32 0.0, %v92_v12  ;;  %v485_v32 = vld [vmem:[#allocation5] sm:$0xff] }
  0x22   :  { %v101_v21 = vsub.f32 0.0, %v93_v13  ;;  %v104_v22 = vmul.f32 1.442695, %v96_v15  ;;  %v106_v23 = vmul.f32 1.442695, %v97_v16  ;;  %v102_v24 = vsub.f32 0.0, %v94_v14 }
  0x23   :  { %v108_v25 = vmul.f32 1.442695, %v98_v18  ;;  %v110_v26 = vmul.f32 1.442695, %v99_v19  ;;  %v112_v27 = vmul.f32 1.442695, %v100_v20  ;;  %v128_v38 = vmul.f32 %v485_v32, %v461_v0 }
  0x24   :  { %319 = vpow2.f32 %v104_v22  ;;  %v103_v28 = vsub.f32 0.0, %v95_v17  ;;  %v114_v29 = vmul.f32 1.442695, %v101_v21  ;;  %v116_v30 = vmul.f32 1.442695, %v102_v24  ;;  %v487_v33 = vld [vmem:[#allocation5 + $0x8] sm:$0xff] }
  0x25   :  { %321 = vpow2.f32 %v106_v23  ;;  %v489_v34 = vld [vmem:[#allocation5 + $0x10] sm:$0xff]  ;;  %v493_v36 = vld [vmem:[#allocation5 + $0x18] sm:$0xff]  ;;  %v495_v37 = vld [vmem:[#allocation5 + $0x20] sm:$0xff]  ;;  %vm64_vm2 = vcmp.gt.f32.partialorder %v485_v32, 0.5  ;;  %vm65_vm3 = vcmp.gt.f32.partialorder %v487_v33, 0.5  ;;  %v120_v41 = vmax.f32 %v461_v0, 0.0 }
  0x26   :  { %323 = vpow2.f32 %v108_v25  ;;  %v118_v31 = vmul.f32 1.442695, %v103_v28  ;;  %v504_v40 = vld [vmem:[#allocation5 + $0x28] sm:$0xff]  ;;  %v129_v42 = vmul.f32 %v487_v33, %v463_v1  ;;  %v130_v43 = vmul.f32 %v489_v34, %v465_v2  ;;  %v524_v50 = vld [vmem:[#allocation5 + $0x30] sm:$0xff]  ;;  %v526_v51 = vld [vmem:[#allocation5 + $0x38] sm:$0xff]  ;;  %s302_s1 = sshll.u32 %s439_s0, 4  ;;  %s303_s1 = int_to_ptr.vmem [resolvable:$true] %s302_s1 }
  0x27   :  { %325 = vpow2.f32 %v110_v26  ;;  %vm66_vm4 = vcmp.gt.f32.partialorder %v489_v34, 0.5  ;;  %v121_v45 = vmax.f32 %v463_v1, 0.0  ;;  %v122_v46 = vmax.f32 %v465_v2, 0.0  ;;  %vm591_vm13 = vmxor %vm64_vm2, %vm56_vm0  ;;  %s407_s21 = scalar_lea.vmem %s303_s1, 128  ;;  %p412_p11 = scmp.lt.s32.totalorder %s303_s1, %s303_s1 }
  0x28   :  { %327 = vpow2.f32 %v112_v27  ;;  %v131_v47 = vmul.f32 %v493_v36, %v467_v3  ;;  %vm67_vm5 = vcmp.gt.f32.partialorder %v493_v36, 0.5  ;;  %vm68_vm6 = vcmp.gt.f32.partialorder %v495_v37, 0.5  ;;  %vm605_vm15 = vmxor %vm65_vm3, %vm57_vm1  ;;  %p408_p10 = scmp.ne.s32.totalorder %s303_s1, %s407_s21  ;;  %p413_p12 = scmp.lt.s32.totalorder %s407_s21, %s407_s21 }
  0x29   :  { %329 = vpow2.f32 %v114_v29  ;;  %v123_v52 = vmax.f32 %v467_v3, 0.0  ;;  %v124_v53 = vmax.f32 %v469_v4, 0.0  ;;  %v125_v54 = vmax.f32 %v471_v5, 0.0 }
  0x2a   :  { %331 = vpow2.f32 %v116_v30  ;;  %vm58_vm7 = vcmp.ge.f32.partialorder %v465_v2, 0.0  ;;  %vm69_vm8 = vcmp.gt.f32.partialorder %v504_v40, 0.5  ;;  %v126_v57 = vmax.f32 %v473_v6, 0.0  ;;  %p414_p13 = por %p413_p12, %p412_p11 }
  0x2b   :  { %333 = vpow2.f32 %v118_v31  ;;  %v132_v58 = vmul.f32 %v495_v37, %v469_v4  ;;  %v133_v59 = vmul.f32 %v504_v40, %v471_v5  ;;  %vm59_vm9 = vcmp.ge.f32.partialorder %v467_v3, 0.0 }
  0x2c   :  { %v127_v61 = vmax.f32 %v476_v8, 0.0  ;;  %v134_v62 = vmul.f32 %v524_v50, %v473_v6  ;;  %v135_v63 = vmul.f32 %v526_v51, %v476_v8  ;;  %vm60_vm10 = vcmp.ge.f32.partialorder %v469_v4, 0.0  ;;  %p415_p0 = pnand %p414_p13, %p408_p10 }
  0x2d   :  { %vm70_vm11 = vcmp.gt.f32.partialorder %v524_v50, 0.5  ;;  %vm71_vm12 = vcmp.gt.f32.partialorder %v526_v51, 0.5  ;;  %v562_v10 = vsub.f32 %v120_v41, %v128_v38  ;;  %v568_v12 = vsub.f32 %v121_v45, %v129_v42 }
  0x2e   :  { %v570_v13 = vsub.f32 %v122_v46, %v130_v43  ;;  %vm62_vm14 = vcmp.ge.f32.partialorder %v473_v6, 0.0  ;;  %v577_v15 = vsub.f32 %v123_v52, %v131_v47  ;;  %v579_v16 = vsub.f32 %v124_v53, %v132_v58 }
  0x2f   :  { %v581_v17 = vsub.f32 %v125_v54, %v133_v59  ;;  %v595_v20 = vsub.f32 %v126_v57, %v134_v62  ;;  %v597_v21 = vsub.f32 %v127_v61, %v135_v63  ;;  %v437_v25 = vmov 0.25  }
  0x30   :  { %v616_v26 = vsel %vm64_vm2, 0.75, %v437_v25  ;;  %v621_v27 = vsel %vm65_vm3, 0.75, %v437_v25  ;;  %v625_v28 = vsel %vm66_vm4, 0.75, %v437_v25  ;;  %vm438_vm0 = vmmov 1   ;;  %vm671_vm3 = vmxor %vm66_vm4, %vm58_vm7 }
  0x31   :  { %v491_v35 = vpop.eup %319  ;;  %vm630_vm1 = vmxor %vm591_vm13, %vm438_vm0  ;;  %v638_v32 = vsel %vm67_vm5, 0.75, %v437_v25  ;;  %v642_v33 = vsel %vm68_vm6, 0.75, %v437_v25  ;;  %v896_v38 = vmov 0  ;;  %v656_v43 = vsel %vm69_vm8, 0.75, %v437_v25 }
  0x32   :  { %v502_v39 = vpop.eup %321  ;;  %v520_v48 = vadd.f32 1.0, %v491_v35  ;;  %v147_v23 = vmul.f32 -0.5, %v491_v35  ;;  %v150_v30 = vand.u32 2147483647, %v491_v35  ;;  %vm647_vm2 = vmxor %vm605_vm15, %vm438_vm0  ;;  %v661_v47 = vsel %vm70_vm11, 0.75, %v437_v25 }
  0x33   :  { %v512_v44 = vpop.eup %323  ;;  %v534_v55 = vadd.f32 1.0, %v502_v39  ;;  %v156_v1 = vmul.f32 -0.5, %v502_v39  ;;  %v897_v38 = vsel %vm647_vm2, 4294967295, %v896_v38  ;;  %v159_v41 = vand.u32 2147483647, %v502_v39  ;;  %vm683_vm13 = vmxor %vm67_vm5, %vm59_vm9 }
  0x34   :  { %v522_v49 = vpop.eup %325  ;;  %v546_v60 = vadd.f32 1.0, %v512_v44  ;;  %335 = vlog2.f32 %v520_v48  ;;  %v165_v42 = vmul.f32 -0.5, %v512_v44  ;;  %v148_v45 = vadd.f32 1.0, %v147_v23  ;;  %vm700_vm5 = vmxor %vm68_vm6, %vm60_vm10 }
  0x35   :  { %v536_v56 = vpop.eup %327  ;;  %v555_v7 = vadd.f32 1.0, %v522_v49  ;;  %337 = vlog2.f32 %v534_v55  ;;  %v174_v46 = vmul.f32 -0.5, %v522_v49  ;;  %v665_v52 = vsel %vm71_vm12, 0.75, %v437_v25  ;;  %vm727_vm6 = vmxor %vm70_vm11, %vm62_vm14 }
  0x36   :  { %v557_v9 = vpop.eup %329  ;;  %v574_v14 = vadd.f32 1.0, %v536_v56  ;;  %339 = vlog2.f32 %v546_v60  ;;  %v157_v54 = vadd.f32 1.0, %v156_v1  ;;  %v168_v57 = vand.u32 2147483647, %v512_v44  ;;  %vm754_vm14 = vmxor %vm671_vm3, %vm438_vm0 }
  0x37   :  { %v565_v11 = vpop.eup %331  ;;  %341 = vlog2.f32 %v555_v7  ;;  %v189_v22 = vadd.f32 1.0, %v557_v9  ;;  %v224_v58 = vsel %vm630_vm1, %v491_v35, 1.0  ;;  %vm687_vm4 = vcmp.lt.f32.partialorder %v150_v30, 0.0004427343  ;;  %vm801_vm2 = vmxor %vm727_vm6, %vm438_vm0 }
  0x38   :  { %v584_v18 = vpop.eup %333  ;;  %343 = vlog2.f32 %v574_v14  ;;  %v612_v24 = vadd.f32 1.0, %v565_v11  ;;  %v183_v59 = vmul.f32 -0.5, %v536_v56  ;;  %vm704_vm7 = vcmp.lt.f32.partialorder %v159_v41, 0.0004427343 }
  0x39   :  { %345 = vlog2.f32 %v189_v22  ;;  %v207_v31 = vadd.f32 1.0, %v584_v18  ;;  %v166_v62 = vadd.f32 1.0, %v165_v42  ;;  %v192_v63 = vmul.f32 -0.5, %v557_v9 }
  0x3a   :  { %347 = vlog2.f32 %v612_v24  ;;  %vm908_vm9 = vcmp.ge.f32.partialorder %v471_v5, 0.0  ;;  %v719_v37 = vmul.f32 %v491_v35, %v148_v45  ;;  %v177_v19 = vand.u32 2147483647, %v522_v49 }
  0x3b   :  { %349 = vlog2.f32 %v207_v31  ;;  %vm714_vm15 = vmxor %vm69_vm8, %vm908_vm9  ;;  %v732_v40 = vmul.f32 %v502_v39, %v157_v54  ;;  %vm734_vm8 = vcmp.lt.f32.partialorder %v168_v57, 0.0004427343  ;;  %v201_v23 = vmul.f32 -0.5, %v565_v11 }
  0x3c   :  { %351 = vrcp.f32 %v520_v48  ;;  %v175_v48 = vadd.f32 1.0, %v174_v46  ;;  %vm915_vm10 = vcmp.ge.f32.partialorder %v476_v8, 0.0  ;;  %v184_v50 = vadd.f32 1.0, %v183_v59  ;;  %vm777_vm9 = vmxor %vm700_vm5, %vm438_vm0 }
  0x3d   :  { %353 = vrcp.f32 %v534_v55  ;;  %vm744_vm11 = vmxor %vm71_vm12, %vm915_vm10  ;;  %v186_v25 = vand.u32 2147483647, %v536_v56  ;;  %v195_v1 = vand.u32 2147483647, %v557_v9  ;;  %v167_v8 = vmul.f32 %v512_v44, %v166_v62 }
  0x3e   :  { %355 = vrcp.f32 %v546_v60  ;;  %v193_v51 = vadd.f32 1.0, %v192_v63  ;;  %v204_v41 = vand.u32 2147483647, %v565_v11  ;;  %vm763_vm12 = vmxor %vm683_vm13, %vm438_vm0  ;;  %v176_v45 = vmul.f32 %v522_v49, %v175_v48 }
  0x3f   :  { %357 = vrcp.f32 %v555_v7  ;;  %vm768_vm3 = vcmp.lt.f32.partialorder %v177_v19, 0.0004427343  ;;  %v210_v53 = vmul.f32 -0.5, %v584_v18  ;;  %v202_v2 = vadd.f32 1.0, %v201_v23  ;;  %vm785_vm13 = vmxor %vm714_vm15, %vm438_vm0 }
  0x40   :  { %359 = vrcp.f32 %v574_v14  ;;  %v213_v59 = vand.u32 2147483647, %v584_v18  ;;  %v185_v3 = vmul.f32 %v536_v56, %v184_v50  ;;  %vm790_vm5 = vcmp.lt.f32.partialorder %v186_v25, 0.0004427343 }
  0x41   :  { %v336_v0 = vpop.eup %335  ;;  %361 = vrcp.f32 %v189_v22  ;;  %vm794_vm10 = vcmp.lt.f32.partialorder %v195_v1, 0.0004427343  ;;  %v930_v19 = vmov 0  ;;  %v194_v23 = vmul.f32 %v557_v9, %v193_v51 }
  0x42   :  { %v338_v60 = vpop.eup %337  ;;  %363 = vrcp.f32 %v612_v24  ;;  %v146_v57 = vmul.f32 0.6931472, %v336_v0  ;;  %v931_v19 = vsel %vm794_vm10, 4294967295, %v930_v19  ;;  %vm806_vm15 = vcmp.lt.f32.partialorder %v204_v41, 0.0004427343  ;;  %vm813_vm10 = vmxor %vm744_vm11, %vm438_vm0 }
  0x43   :  { %v340_v30 = vpop.eup %339  ;;  %365 = vrcp.f32 %v207_v31  ;;  %v155_v24 = vmul.f32 0.6931472, %v338_v60  ;;  %v211_v1 = vadd.f32 1.0, %v210_v53  ;;  %v227_v51 = vsel %vm763_vm12, %v522_v49, 1.0 }
  0x44   :  { %v342_v42 = vpop.eup %341  ;;  %v164_v4 = vmul.f32 0.6931472, %v340_v30  ;;  %v226_v30 = vsel %vm754_vm14, %v512_v44, 1.0  ;;  %v152_v41 = vsel %vm687_vm4, %v719_v37, %v146_v57  ;;  %v203_v6 = vmul.f32 %v565_v11, %v202_v2 }
  0x45   :  { %v344_v54 = vpop.eup %343  ;;  %v173_v0 = vmul.f32 0.6931472, %v342_v42  ;;  %vm827_vm0 = vcmp.lt.f32.partialorder %v213_v59, 0.0004427343  ;;  %v161_v44 = vsel %vm704_vm7, %v732_v40, %v155_v24  ;;  %v228_v49 = vsel %vm777_vm9, %v536_v56, 1.0 }
  0x46   :  { %v346_v62 = vpop.eup %345  ;;  %v182_v5 = vmul.f32 0.6931472, %v344_v54  ;;  %v229_v34 = vsel %vm785_vm13, %v557_v9, 1.0  ;;  %v230_v37 = vsel %vm801_vm2, %v565_v11, 1.0  ;;  %v170_v14 = vsel %vm734_vm8, %v167_v8, %v164_v4 }
  0x47   :  { %v348_v50 = vpop.eup %347  ;;  %v191_v42 = vmul.f32 0.6931472, %v346_v62  ;;  %v179_v36 = vsel %vm768_vm3, %v176_v45, %v173_v0  ;;  %v231_v56 = vsel %vm813_vm10, %v584_v18, 1.0  ;;  %v212_v22 = vmul.f32 %v584_v18, %v211_v1 }
  0x48   :  { %v350_v53 = vpop.eup %349  ;;  %v200_v40 = vmul.f32 0.6931472, %v348_v50  ;;  %v188_v9 = vsel %vm790_vm5, %v185_v3, %v182_v5  ;;  %v216_v11 = vadd.f32 %v152_v41, %v562_v10  ;;  %vm940_vm2 = vnez %v931_v19 }
  0x49   :  { %v352_v7 = vpop.eup %351  ;;  %v197_v45 = vsel %vm940_vm2, %v194_v23, %v191_v42  ;;  %v209_v46 = vmul.f32 0.6931472, %v350_v53  ;;  %v217_v57 = vadd.f32 %v161_v44, %v568_v12  ;;  %vm941_vm4 = vnez %v897_v38 }
  0x4a   :  { %v354_v54 = vpop.eup %353  ;;  %v248_v55 = vmul.f32 %v352_v7, %v224_v58  ;;  %v942_v2 = vsel %vm941_vm4, %v502_v39, 1.0  ;;  %v218_v10 = vadd.f32 %v170_v14, %v570_v13  ;;  %v219_v29 = vadd.f32 %v179_v36, %v577_v15 }
  0x4b   :  { %v356_v8 = vpop.eup %355  ;;  %v249_v59 = vmul.f32 %v354_v54, %v942_v2  ;;  %v206_v63 = vsel %vm806_vm15, %v203_v6, %v200_v40  ;;  %v220_v24 = vadd.f32 %v188_v9, %v579_v16  ;;  %v221_v38 = vadd.f32 %v197_v45, %v581_v17 }
  0x4c   :  { %v358_v18 = vpop.eup %357  ;;  %v250_v62 = vmul.f32 %v356_v8, %v226_v30  ;;  %v256_v35 = vmul.f32 %v248_v55, %v248_v55  ;;  %v215_v15 = vsel %vm827_vm0, %v212_v22, %v209_v46 }
  0x4d   :  { %v360_v58 = vpop.eup %359  ;;  %v251_v3 = vmul.f32 %v358_v18, %v227_v51  ;;  %v257_v12 = vmul.f32 %v249_v59, %v249_v59  ;;  %v223_v6 = vadd.f32 %v215_v15, %v597_v21 }
  0x4e   :  { %v362_v48 = vpop.eup %361  ;;  %v252_v39 = vmul.f32 %v360_v58, %v228_v49  ;;  %v258_v19 = vmul.f32 %v250_v62, %v250_v62  ;;  %v272_v31 = vmul.f32 %v616_v26, %v256_v35  ;;  %v222_v26 = vadd.f32 %v206_v63, %v595_v20 }
  0x4f   :  { %v364_v13 = vpop.eup %363  ;;  %v253_v4 = vmul.f32 %v362_v48, %v229_v34  ;;  %v259_v0 = vmul.f32 %v251_v3, %v251_v3  ;;  %v273_v23 = vmul.f32 %v621_v27, %v257_v12 }
  0x50   :  { %v366_v60 = vpop.eup %365  ;;  %v254_v50 = vmul.f32 %v364_v13, %v230_v37  ;;  %v260_v16 = vmul.f32 %v252_v39, %v252_v39  ;;  %v274_v25 = vmul.f32 %v625_v28, %v258_v19  ;;  %v280_v5 = vmul.f32 %v272_v31, %v216_v11 }
  0x51   :  { %v255_v1 = vmul.f32 %v366_v60, %v231_v56  ;;  %v261_v17 = vmul.f32 %v253_v4, %v253_v4  ;;  %v275_v30 = vmul.f32 %v638_v32, %v259_v0  ;;  %v281_v51 = vmul.f32 %v273_v23, %v217_v57 }
  0x52   :  { %v262_v41 = vmul.f32 %v254_v50, %v254_v50  ;;  %v276_v61 = vmul.f32 %v642_v33, %v260_v16  ;;  %v282_v42 = vmul.f32 %v274_v25, %v218_v10 }
  0x53   :  { %v263_v27 = vmul.f32 %v255_v1, %v255_v1  ;;  %v277_v53 = vmul.f32 %v656_v43, %v261_v17  ;;  %v283_v44 = vmul.f32 %v275_v30, %v219_v29  ;;  %v288_v32 = vadd.f32 %v281_v51, %v280_v5 }
  0x54   :  { %v278_v28 = vmul.f32 %v661_v47, %v262_v41  ;;  %v284_v49 = vmul.f32 %v276_v61, %v220_v24 }
  0x55   :  { %v279_v34 = vmul.f32 %v665_v52, %v263_v27  ;;  %v285_v37 = vmul.f32 %v277_v53, %v221_v38  ;;  %v289_v7 = vadd.f32 %v283_v44, %v282_v42 }
  0x56   :  { %v286_v14 = vmul.f32 %v278_v28, %v222_v26 }
  0x57   :  { %v287_v20 = vmul.f32 %v279_v34, %v223_v6  ;;  %v290_v36 = vadd.f32 %v285_v37, %v284_v49  ;;  %v292_v33 = vadd.f32 %v289_v7, %v288_v32 }
  0x59   :  { %v291_v40 = vadd.f32 %v287_v20, %v286_v14 }
  0x5b   :  { %v293_v21 = vadd.f32 %v291_v40, %v290_v36 }
  0x5d   :  { %v294_v56 = vadd.f32 %v293_v21, %v292_v33 }
  0x5f   :  { %295 = vst [vmem:[#allocation7] sm:$0xff] %v294_v56 }
  0x60   :  { %418 = shalt.err (!%p415_p0)
}
  0x61   :  { %305 = dma.vmem_to_hbm [thread:$0]  %s303_s1, 128, %s888_s2, [#allocation4]  }
  0x62   :  { %431 = dma.done.wait [#allocation4], 128  }
  0x63   :  { %432 = vsyncadd [#allocation4], 4294967168 }
  0x64   :  { %309 = vsyncpa [#allocation3], 1 }
  0x65   :  { %310 = vsyncpa [#allocation6], 1 }
  0x66   :  { %311 = vsyncpa [#allocation4], 1 }

</bundles_post_ra>
